<compile_context>
chip_gen: v7x
topology: tpu7x:2x2x1
jax: 0.10.0
libtpu: 0.0.40
codegen_flags: <defaults>
</compile_context>

<pallas_src>
import math

import jax
import jax.numpy as jnp
import numpy as np
from jax.experimental import pallas as pl
from jax.experimental.pallas import tpu as pltpu


def conv1x1_mulchain_kernel(x_ref, p_ref, o_ref):
    """1x1 conv with C_in=2 plus the mul chain, entirely on the VPU.

    x_ref : (C_in=2, HW=9)  f32 -- the two input channels, flattened spatial
    p_ref : (C_out=3, 3)    f32 -- columns are [w(:,0), w(:,1), bias]
    o_ref : (C_out=3, HW=9) f32 -- three output channels
    """
    x0 = x_ref[0:1, :]            # (1, HW)  static sublane slices
    x1 = x_ref[1:2, :]
    w0 = p_ref[:, 0:1]            # (C_out, 1) static lane slices
    w1 = p_ref[:, 1:2]
    b = p_ref[:, 2:3]
    # Explicit 2-term contraction + bias: pure VALU broadcasts, no MXU traffic.
    y = w0 * x0 + w1 * x1 + b
    # x = mul(x, x * 2), four times.  Keep the exact y*(y*2) op order for
    # bit-parity with the step-by-step reference (repeated-squaring rewrite
    # would change the last ulp and can flip the truncated integer).
    for _ in range(4):
        y = y * (y * 2.0)
    o_ref[...] = y


def model_forward(x_nchw, weight, bias):
    # x_nchw stands in for the `torch.rand(1, 2, 3, 3)` drawn inside forward()
    # (the reference module ignores its argument); weight/bias are Conv2d params.
    n, c_in, h, w = x_nchw.shape
    assert n == 1, "wrapper assumes batch == 1 (as in the reference module)"
    c_out = weight.shape[0]
    hw = h * w

    x2d = x_nchw.reshape(c_in, hw).astype(jnp.float32)            # (2, 9)
    w2d = weight.reshape(c_out, c_in).astype(jnp.float32)         # (3, 2)
    params = jnp.concatenate(                                     # (3, 3): [w0|w1|b]
        [w2d, bias.astype(jnp.float32)[:, None]], axis=1
    )

    out_f32 = pl.pallas_call(
        conv1x1_mulchain_kernel,
        out_shape=jax.ShapeDtypeStruct((c_out, hw), jnp.float32),
        in_specs=[
            pl.BlockSpec(memory_space=pltpu.MemorySpace.VMEM),
            pl.BlockSpec(memory_space=pltpu.MemorySpace.VMEM),
        ],
        out_specs=pl.BlockSpec(memory_space=pltpu.MemorySpace.VMEM),
        # Honest, tiny cost hint matching the new (2-input) DMA footprint.
        cost_estimate=pl.CostEstimate(
            flops=13 * c_out * hw,
            transcendentals=0,
            bytes_accessed=4 * (c_in * hw + c_out * (c_in + 1) + c_out * hw),
        ),
    )(x2d, params)

    out_nchw = out_f32.reshape(n, c_out, h, w)

    # Final-boundary truncating cast to int64 (torch .to(torch.int64)).
    # Scoped x64 toggle instead of a global flag so the rest of the program
    # stays 32-bit.  int64 is required: values reach ~5e9 (> int32 max).
    prev_x64 = bool(jax.config.jax_enable_x64)
    jax.config.update("jax_enable_x64", True)
    try:
        out_i64 = out_nchw.astype(jnp.int64)
    finally:
        jax.config.update("jax_enable_x64", prev_x64)
    return out_i64


if __name__ == "__main__":
    key = jax.random.PRNGKey(0)
    k_x, k_w, k_b = jax.random.split(key, 3)

    C_IN, C_OUT, H, W = 2, 3, 3, 3

    # stands in for the `torch.rand(1, 2, 3, 3)` drawn inside forward()
    x = jax.random.uniform(k_x, (1, C_IN, H, W), dtype=jnp.float32)

    # deterministic Conv2d(2, 3, 1) params, PyTorch-style uniform(-1/sqrt(fan_in), ..)
    fan_in = C_IN * 1 * 1
    bound = 1.0 / math.sqrt(fan_in)
    weight = jax.random.uniform(
        k_w, (C_OUT, C_IN, 1, 1), dtype=jnp.float32, minval=-bound, maxval=bound
    )
    bias = jax.random.uniform(
        k_b, (C_OUT,), dtype=jnp.float32, minval=-bound, maxval=bound
    )

    out = model_forward(x, weight, bias)
    jax.block_until_ready(out)

    assert out.shape == (1, C_OUT, H, W)
    assert out.dtype == jnp.int64

    # numpy f32 reference using the identical elementwise op sequence
    # TODO(synk): torch's Conv2d may use a different FMA/accumulation order;
    # the self-check mirrors this kernel's op order, not cuDNN/oneDNN.
    w2d_np = np.asarray(weight, dtype=np.float32).reshape(C_OUT, C_IN)
    b_np = np.asarray(bias, dtype=np.float32)
    x_np = np.asarray(x, dtype=np.float32).reshape(C_IN, H * W)
    y_ref = (
        w2d_np[:, 0:1] * x_np[0:1, :]
        + w2d_np[:, 1:2] * x_np[1:2, :]
        + b_np[:, None]
    ).astype(np.float32)
    for _ in range(4):
        y_ref = (y_ref * (y_ref * np.float32(2.0))).astype(np.float32)
    ref = y_ref.reshape(1, C_OUT, H, W).astype(np.int64)
    assert np.array_equal(np.asarray(out), ref), "mismatch vs reference"

    print("KERNEL_OK")
</pallas_src>

<mosaic_0001>
module attributes {stable_mosaic.version = 11 : i64} {
  func.func @conv1x1_mulchain_kernel(%arg0: memref<2x9xf32, #tpu.memory_space<vmem>>, %arg1: memref<3x3xf32, #tpu.memory_space<vmem>>, %arg2: memref<3x9xf32, #tpu.memory_space<vmem>>) attributes {dimension_semantics = [], scalar_prefetch = 0 : i64, scratch_operands = 0 : i64, tpu.core_type = #tpu.core_type<tc>} {
    %c0 = arith.constant 0 : index
    %c0_0 = arith.constant 0 : index
    %0 = vector.load %arg0[%c0, %c0_0] : memref<2x9xf32, #tpu.memory_space<vmem>>, vector<1x9xf32>
    %c1 = arith.constant 1 : index
    %c0_1 = arith.constant 0 : index
    %1 = vector.load %arg0[%c1, %c0_1] : memref<2x9xf32, #tpu.memory_space<vmem>>, vector<1x9xf32>
    %c0_2 = arith.constant 0 : index
    %c0_3 = arith.constant 0 : index
    %2 = vector.load %arg1[%c0_2, %c0_3] : memref<3x3xf32, #tpu.memory_space<vmem>>, vector<3x1xf32>
    %c0_4 = arith.constant 0 : index
    %c1_5 = arith.constant 1 : index
    %3 = vector.load %arg1[%c0_4, %c1_5] : memref<3x3xf32, #tpu.memory_space<vmem>>, vector<3x1xf32>
    %c0_6 = arith.constant 0 : index
    %c2 = arith.constant 2 : index
    %4 = vector.load %arg1[%c0_6, %c2] : memref<3x3xf32, #tpu.memory_space<vmem>>, vector<3x1xf32>
    %5 = vector.broadcast %2 : vector<3x1xf32> to vector<3x9xf32>
    %6 = vector.broadcast %0 : vector<1x9xf32> to vector<3x9xf32>
    %7 = arith.mulf %5, %6 : vector<3x9xf32>
    %8 = vector.broadcast %3 : vector<3x1xf32> to vector<3x9xf32>
    %9 = vector.broadcast %1 : vector<1x9xf32> to vector<3x9xf32>
    %10 = arith.mulf %8, %9 : vector<3x9xf32>
    %11 = arith.addf %7, %10 : vector<3x9xf32>
    %12 = vector.broadcast %4 : vector<3x1xf32> to vector<3x9xf32>
    %13 = arith.addf %11, %12 : vector<3x9xf32>
    %cst = arith.constant 2.000000e+00 : f32
    %14 = vector.broadcast %cst : f32 to vector<3x9xf32>
    %15 = arith.mulf %13, %14 : vector<3x9xf32>
    %16 = arith.mulf %13, %15 : vector<3x9xf32>
    %cst_7 = arith.constant 2.000000e+00 : f32
    %17 = vector.broadcast %cst_7 : f32 to vector<3x9xf32>
    %18 = arith.mulf %16, %17 : vector<3x9xf32>
    %19 = arith.mulf %16, %18 : vector<3x9xf32>
    %cst_8 = arith.constant 2.000000e+00 : f32
    %20 = vector.broadcast %cst_8 : f32 to vector<3x9xf32>
    %21 = arith.mulf %19, %20 : vector<3x9xf32>
    %22 = arith.mulf %19, %21 : vector<3x9xf32>
    %cst_9 = arith.constant 2.000000e+00 : f32
    %23 = vector.broadcast %cst_9 : f32 to vector<3x9xf32>
    %24 = arith.mulf %22, %23 : vector<3x9xf32>
    %25 = arith.mulf %22, %24 : vector<3x9xf32>
    %c0_10 = arith.constant 0 : index
    %c0_11 = arith.constant 0 : index
    %26 = vector.load %arg2[%c0_10, %c0_11] : memref<3x9xf32, #tpu.memory_space<vmem>>, vector<3x9xf32>
    tpu.vector_store %arg2[%c0_10, %c0_11], %25 {strides = array<i32>} : memref<3x9xf32, #tpu.memory_space<vmem>>, vector<3x9xf32>,
    return
  }
}

</mosaic_0001>

<bundles_post_ra>
// kernel: tpu_custom_call.1
= control target key start
LH: loop header
LB: loop body
LE: loop exit
PB: predicated region body
PF: predicated region fallthrough
CT: control target
= control target key end

     0   :  { %7 = vsyncpa [#allocation3], 0  ;;  %s231_s0 = inlined_call_operand.hbm [shape: f32[2,9], index: 0, kind: input, shape index: {}]   ;;  %s232_s1 = inlined_call_operand.hbm [shape: f32[3,3], index: 1, kind: input, shape index: {}]   ;;  %s233_s2 = inlined_call_operand.hbm [shape: f32[3,9], index: 2, kind: output, shape index: {}]  }
   0x1   :  { %8 = vsyncpa [#allocation6], 0 }
   0x2   :  { %9 = vsyncpa [#allocation4], 0  ;;  %s174_s9 = smov [#allocation2]   ;;  %s175_s11 = smov [#allocation5]  }
   0x3   :  { %s16_s10 = sshll.u32 %s174_s9, 4  ;;  %s26_s12 = sshll.u32 %s175_s11, 4  ;;  %s17_s10 = int_to_ptr.vmem [resolvable:$true] %s16_s10  ;;  %s27_s12 = int_to_ptr.vmem [resolvable:$true] %s26_s12 }
   0x4   :  { %s102_s15 = scalar_lea.hbm %s231_s0, 32 }
   0x5   :  { %p103_p0 = scmp.ne.s32.totalorder %s231_s0, %s102_s15  ;;  %p106_p1 = scmp.lt.u32.totalorder %s102_s15, %s231_s0 }
   0x7   :  { %p108_p2 = pnand %p106_p1, %p103_p0 }
   0x9   :  { %111 = shalt.err (!%p108_p2)
}
   0xa   :  { %s112_s20 = scalar_lea.vmem %s17_s10, 32  ;;  %p117_p4 = scmp.lt.s32.totalorder %s17_s10, %s17_s10 }
   0xb   :  { %p113_p3 = scmp.ne.s32.totalorder %s17_s10, %s112_s20  ;;  %p118_p5 = scmp.lt.s32.totalorder %s112_s20, %s112_s20 }
   0xd   :  { %p119_p6 = por %p118_p5, %p117_p4 }
   0xf   :  { %p120_p7 = pnand %p119_p6, %p113_p3 }
  0x11   :  { %123 = shalt.err (!%p120_p7)
}
  0x12   :  { %19 = dma.hbm_to_vmem [thread:$0]  %s231_s0, 32, %s17_s10, [#allocation3]  }
  0x13   :  { %s124_s25 = scalar_lea.hbm %s232_s1, 64 }
  0x14   :  { %p125_p8 = scmp.ne.s32.totalorder %s232_s1, %s124_s25  ;;  %p128_p9 = scmp.lt.u32.totalorder %s124_s25, %s232_s1 }
  0x16   :  { %p130_p10 = pnand %p128_p9, %p125_p8 }
  0x18   :  { %133 = shalt.err (!%p130_p10)
}
  0x19   :  { %s134_s30 = scalar_lea.vmem %s27_s12, 64  ;;  %p139_p12 = scmp.lt.s32.totalorder %s27_s12, %s27_s12 }
  0x1a   :  { %p135_p11 = scmp.ne.s32.totalorder %s27_s12, %s134_s30  ;;  %p140_p13 = scmp.lt.s32.totalorder %s134_s30, %s134_s30 }
  0x1c   :  { %p141_p0 = por %p140_p13, %p139_p12 }
  0x1e   :  { %p142_p1 = pnand %p141_p0, %p135_p11 }
  0x20   :  { %145 = shalt.err (!%p142_p1)
}
  0x21   :  { %29 = dma.hbm_to_vmem [thread:$0]  %s232_s1, 64, %s27_s12, [#allocation6]  }
  0x22   :  { %168 = dma.done.wait [#allocation3], 32  }
  0x23   :  { %169 = vsyncadd [#allocation3], 4294967264 }
  0x24   :  { %170 = dma.done.wait [#allocation6], 64  }
  0x25   :  { %171 = vsyncadd [#allocation6], 4294967232  ;;  %v176_v0 = vmov 0   ;;  %v177_v1 = vmov 2   ;;  %v38_v2 = vld [vmem:[#allocation5] sm:$0x7] }
  0x26   :  { %98 = vset.pattern.permute.xlu0 %v176_v0  ;;  %100 = vset.pattern.permute.xlu1 %v177_v1  ;;  %v178_v3 = vmov 1   ;;  %v90_v5 = vld [vmem:[#allocation2] ss:$0 sm:$0xff]  ;;  %v91_v6 = vld [vmem:[#allocation2 + $0x1] ss:$0 sm:$0xff]  ;;  %s179_s1 = smov [#allocation7]  }
  0x27   :  { %41 = vperm.xlu0 %98, %v38_v2   ;;  %60 = vperm.xlu1 %100, %v38_v2   ;;  %s80_s4 = sshll.u32 %s179_s1, 4  ;;  %vm72_vm0 = vcmask 67584   ;;  %s81_s4 = int_to_ptr.vmem [resolvable:$true] %s80_s4 }
  0x28   :  { %s146_s5 = scalar_lea.vmem %s81_s4, 64  ;;  %p151_p3 = scmp.lt.s32.totalorder %s81_s4, %s81_s4 }
  0x29   :  { %p147_p2 = scmp.ne.s32.totalorder %s81_s4, %s146_s5  ;;  %p152_p4 = scmp.lt.s32.totalorder %s146_s5, %s146_s5 }
  0x2b   :  { %99 = vset.pattern.permute.xlu0 %v178_v3  ;;  %p153_p5 = por %p152_p4, %p151_p3 }
  0x2c   :  { %50 = vperm.xlu0 %99, %v38_v2  }
  0x2d   :  { %p154_p6 = pnand %p153_p5, %p147_p2 }
  0x30   :  { %101 = vset.pattern.permute.xlu0 %v177_v1 }
  0xa6   :  { %v42_v4 = vpop.permute.xlu0 %41  ;;  %v61_v10 = vpop.permute.xlu1 %60 }
  0xa7   :  { %v48_v8 = vmul.f32 %v90_v5, %v42_v4 }
  0xab   :  { %v51_v7 = vpop.permute.xlu0 %50 }
  0xac   :  { %v57_v9 = vmul.f32 %v91_v6, %v51_v7 }
  0xae   :  { %v58_v11 = vadd.f32 %v57_v9, %v48_v8 }
  0xb0   :  { %v63_v12 = vadd.f32 %v61_v10, %v58_v11 }
  0xb2   :  { %v64_v13 = vmul.f32 2.0, %v63_v12 }
  0xb4   :  { %v65_v14 = vmul.f32 %v64_v13, %v63_v12 }
  0xb6   :  { %v66_v15 = vmul.f32 2.0, %v65_v14 }
  0xb8   :  { %v67_v16 = vmul.f32 %v66_v15, %v65_v14 }
  0xba   :  { %v68_v17 = vmul.f32 2.0, %v67_v16 }
  0xbc   :  { %v69_v18 = vmul.f32 %v68_v17, %v67_v16 }
  0xbe   :  { %v70_v19 = vmul.f32 2.0, %v69_v18 }
  0xc0   :  { %v71_v20 = vmul.f32 %v70_v19, %v69_v18 }
  0xc2   :  { %73 = vst.msk [vmem:[#allocation7] sm:$0x7] %vm72_vm0, %v71_v20 }
  0xc3   :  { %157 = shalt.err (!%p154_p6)
}
  0xc4   :  { %s158_s8 = scalar_lea.hbm %s233_s2, 64 }
  0xc5   :  { %p159_p7 = scmp.ne.s32.totalorder %s233_s2, %s158_s8  ;;  %p162_p8 = scmp.lt.u32.totalorder %s158_s8, %s233_s2 }
  0xc7   :  { %p164_p9 = pnand %p162_p8, %p159_p7 }
  0xc9   :  { %167 = shalt.err (!%p164_p9)
}
  0xca   :  { %83 = dma.vmem_to_hbm [thread:$0]  %s81_s4, 64, %s233_s2, [#allocation4]  }
  0xcb   :  { %172 = dma.done.wait [#allocation4], 64  }
  0xcc   :  { %173 = vsyncadd [#allocation4], 4294967232 }
  0xcd   :  { %87 = vsyncpa [#allocation3], 1 }
  0xce   :  { %88 = vsyncpa [#allocation6], 1 }
  0xcf   :  { %89 = vsyncpa [#allocation4], 1 }

</bundles_post_ra>
